<compile_context>
chip_gen: v5e
topology: v5e:2x2
jax: 0.10.0
libtpu: 0.0.40
codegen_flags: <defaults>
</compile_context>

<pallas_src>
import jax
import jax.numpy as jnp
from jax.experimental import pallas as pl
from jax.experimental.pallas import tpu as pltpu

_MIB = 1024 * 1024


def _round_up(x, m):
    return ((x + m - 1) // m) * m


def _vmem_capacity_bytes():
    """Physical VMEM of the local chip; conservative fallback if unavailable."""
    try:
        return int(pltpu.get_tpu_info().vmem_capacity_bytes)
    except Exception:
        return 64 * _MIB  # v7x-sized fallback is safe on every generation


def _per_lane_vmem_bytes(c_in, c_h, in_itemsize):
    """Approximate VMEM bytes needed per H*W lane of a tile (both streams)."""
    inputs = 2 * 2 * c_in * in_itemsize      # 2 streams, double-buffered blocks
    concat = 2 * c_in * in_itemsize          # fused (x | t) matmul operand
    f1_f32 = 2 * c_h * 4                     # stage-1 activations (f32)
    f1_lp = 2 * c_h * in_itemsize            # stage-1 cast for stage-2 matmul
    f2_f32 = 2 * c_h * 4                     # stage-2 activations (f32)
    diffs = 2 * c_h * 4                      # d1, d2
    epilog = 2 * c_h * 4                     # squares / reduce temporaries
    accum = 2 * 2 * 4                        # (2, tile) f32 accumulator block
    return inputs + concat + f1_f32 + f1_lp + f2_f32 + diffs + epilog + accum


def _pick_tile_hw(hw, c_in, c_h, in_itemsize, vmem_limit_bytes, max_tile=32768):
    """Largest lane-friendly (multiple-of-128) H*W tile within the VMEM budget."""
    budget = int(vmem_limit_bytes * 0.55)    # headroom for compiler temps/weights
    cap = budget // _per_lane_vmem_bytes(c_in, c_h, in_itemsize)
    cap = max(128, (cap // 128) * 128)
    cap = min(cap, max_tile)
    hw_128 = _round_up(hw, 128)
    if hw_128 <= cap:
        return hw_128
    # Split into the fewest tiles that fit the cap, then size tiles evenly so
    # zero-padding of the ragged edge stays small.
    n_tiles = pl.cdiv(hw_128, cap)
    return _round_up(pl.cdiv(hw_128, n_tiles), 128)


# ---------------------------------------------------------------------------
# Fused kernel: both feature stages (input & target streams) + per-layer
# squared-error partial sums, accumulated into a resident lane-dense output.
#
#   w1 : (C_h, C_in)   w2 : (C_h, C_h)        (resident, constant index_map)
#   x, t blocks : (1, C_in, TILE_HW)
#   s block     : (1, 1, 2, TILE_HW)  f32, resident across the hw (last) axis
# ---------------------------------------------------------------------------
def _fused_perceptual_loss_kernel(w1_ref, w2_ref, x_ref, t_ref, s_ref):
    @pl.when(pl.program_id(2) == 0)
    def _init():
        s_ref[...] = jnp.zeros_like(s_ref)

    tile = x_ref.shape[-1]
    w1 = w1_ref[...]
    w2 = w2_ref[...]

    # Fuse the input & target streams into ONE wide matmul per stage: the
    # operand becomes (C, 2*tile), amortizing MXU weight pushes / vmatmul issue
    # overhead (K = C_in / C_h is far below the MXU dimension).
    xt = jnp.concatenate([x_ref[0], t_ref[0]], axis=-1)            # (C_in, 2*tile)
    f1 = jnp.maximum(jnp.dot(w1, xt, preferred_element_type=jnp.float32), 0.0)
    f2 = jnp.maximum(
        jnp.dot(w2, f1.astype(w2.dtype), preferred_element_type=jnp.float32), 0.0)

    d1 = f1[:, :tile] - f1[:, tile:]                                # f32 epilogue
    d2 = f2[:, :tile] - f2[:, tile:]
    s_ref[:, :, 0:1, :] += jnp.sum(d1 * d1, axis=0, keepdims=True)[None, None]
    s_ref[:, :, 1:2, :] += jnp.sum(d2 * d2, axis=0, keepdims=True)[None, None]


def fused_perceptual_sse(w1, w2, x3, t3):
    """Returns (sse_layer1, sse_layer2) summed over the whole batch."""
    n, c_in, hw = x3.shape
    c_h = w1.shape[0]
    itemsize = jnp.dtype(x3.dtype).itemsize

    # Generation-aware VMEM budget: ~48 MiB on v7x (64 MiB physical),
    # ~96 MiB on v5e/v6e (128 MiB physical).
    vmem_cap = _vmem_capacity_bytes()
    vmem_limit = max(32 * _MIB, min((vmem_cap * 3) // 4, 100 * _MIB))
    tile_hw = _pick_tile_hw(hw, c_in, c_h, itemsize, vmem_limit)

    # Megacore balance: if batch == 1, split hw into an extra parallel axis so
    # both v7x TensorCores get work (no effect on single-TC v5e/v6e).
    n_tiles = pl.cdiv(hw, tile_hw)
    hw_outer = 2 if (n == 1 and n_tiles >= 2) else 1
    n_tiles = _round_up(n_tiles, hw_outer)
    hw_inner = n_tiles // hw_outer
    hw_pad = n_tiles * tile_hw

    if hw_pad != hw:
        # Zero padding contributes exactly 0 to both layers' SSE: ReLU(W @ 0)=0.
        # TODO(synk): mask ragged edge tiles in-kernel instead of padding in HBM.
        pad = ((0, 0), (0, 0), (0, hw_pad - hw))
        x3 = jnp.pad(x3, pad)
        t3 = jnp.pad(t3, pad)

    flops = int(4 * (c_in * c_h + c_h * c_h) * n * hw_pad)   # 2 streams x 2 matmuls
    bytes_accessed = int(
        2 * n * c_in * hw_pad * itemsize                          # input + target
        + (c_h * c_in + c_h * c_h) * jnp.dtype(w1.dtype).itemsize # weights
        + n * hw_outer * 2 * tile_hw * 4                          # partial sums
    )

    grid_spec = pltpu.PrefetchScalarGridSpec(
        num_scalar_prefetch=0,
        grid=(n, hw_outer, hw_inner),
        in_specs=[
            pl.BlockSpec((c_h, c_in), lambda i, o, k: (0, 0)),     # w1 resident
            pl.BlockSpec((c_h, c_h), lambda i, o, k: (0, 0)),      # w2 resident
            pl.BlockSpec((1, c_in, tile_hw),
                         lambda i, o, k: (i, 0, o * hw_inner + k)),  # input
            pl.BlockSpec((1, c_in, tile_hw),
                         lambda i, o, k: (i, 0, o * hw_inner + k)),  # target
        ],
        out_specs=pl.BlockSpec((1, 1, 2, tile_hw),
                               lambda i, o, k: (i, o, 0, 0)),      # merged SSE acc
    )

    s = pl.pallas_call(
        _fused_perceptual_loss_kernel,
        out_shape=jax.ShapeDtypeStruct((n, hw_outer, 2, tile_hw), jnp.float32),
        grid_spec=grid_spec,
        compiler_params=pltpu.CompilerParams(
            dimension_semantics=("parallel", "parallel", "arbitrary"),
            vmem_limit_bytes=int(vmem_limit),
        ),
        cost_estimate=pl.CostEstimate(
            flops=flops, transcendentals=0, bytes_accessed=bytes_accessed),
    )(w1, w2, x3, t3)

    # Tiny final reduction (a few KB) outside the kernel.
    s = jnp.sum(s, axis=(0, 1, 3))   # (2,)
    return s[0], s[1]


# ---------------------------------------------------------------------------
# Module equivalent
# ---------------------------------------------------------------------------
class SimpleFeatureExtractor:
    """Concrete stand-in for BaseFeatureExtractor with a 2-stage extractor."""

    def __init__(self, in_channels, hidden_channels, layer_weights, key,
                 compute_dtype=jnp.bfloat16):
        k1, k2 = jax.random.split(key)
        # Deterministic synthetic "pretrained" weights.  bf16 storage halves the
        # HBM read traffic of the memory-bound kernel; accumulation stays f32.
        self.compute_dtype = compute_dtype
        self.w1 = (jax.random.normal(k1, (hidden_channels, in_channels),
                                     dtype=jnp.float32) * 0.1).astype(compute_dtype)
        self.w2 = (jax.random.normal(k2, (hidden_channels, hidden_channels),
                                     dtype=jnp.float32) * 0.1).astype(compute_dtype)
        self.layer_weights = list(layer_weights)

    def _to_batched_cm(self, x_nchw):
        # NCHW -> (N, C, H*W): a free reshape, no HBM transpose pass.
        n, c, h, w = x_nchw.shape
        return x_nchw.astype(self.compute_dtype).reshape(n, c, h * w)

    def _extract_features(self, x_nchw):
        # Unfused debug/reference helper (pure JAX) with the SAME dtype path as
        # the fused kernel; forward() uses the fused kernel.
        xm = self._to_batched_cm(x_nchw)
        f1 = jnp.maximum(
            jnp.einsum("oc,nch->noh", self.w1, xm,
                       preferred_element_type=jnp.float32), 0.0)
        f2 = jnp.maximum(
            jnp.einsum("oc,nch->noh", self.w2, f1.astype(self.compute_dtype),
                       preferred_element_type=jnp.float32), 0.0)
        return [f1, f2]

    def forward(self, inp, tgt):
        x3 = self._to_batched_cm(inp)
        t3 = self._to_batched_cm(tgt)
        n, _, hw = x3.shape
        c_h = self.w1.shape[0]

        sse1, sse2 = fused_perceptual_sse(self.w1, self.w2, x3, t3)

        feat_elems = jnp.float32(n * c_h * hw)  # elements per feature map
        mse1 = sse1 / feat_elems
        mse2 = sse2 / feat_elems
        return (jnp.float32(self.layer_weights[0]) * mse1
                + jnp.float32(self.layer_weights[1]) * mse2)


# ---------------------------------------------------------------------------
# Pure-JAX reference for verification (mirrors the PyTorch forward exactly,
# using the module's own _extract_features so dtype paths match the kernel).
# ---------------------------------------------------------------------------
def reference_forward(model, inp, tgt):
    fi = model._extract_features(inp)
    ft = model._extract_features(tgt)
    loss = jnp.float32(0.0)
    for i in range(len(fi)):
        loss = loss + jnp.float32(model.layer_weights[i]) * jnp.mean(
            (fi[i] - ft[i]) ** 2)
    return loss


if __name__ == "__main__":
    key = jax.random.PRNGKey(0)
    k_in, k_tg, k_w = jax.random.split(key, 3)

    N, C, H, W = 2, 4, 16, 16          # small NCHW shapes, PyTorch convention
    inp = jax.random.normal(k_in, (N, C, H, W), dtype=jnp.float32)
    tgt = jax.random.normal(k_tg, (N, C, H, W), dtype=jnp.float32)

    # Default bf16 storage path (fast, memory-bound win), f32 accumulation.
    model_bf16 = SimpleFeatureExtractor(
        in_channels=C, hidden_channels=8, layer_weights=[0.6, 0.4], key=k_w,
        compute_dtype=jnp.bfloat16)
    loss_bf16 = jax.block_until_ready(model_bf16.forward(inp, tgt))
    ref_bf16 = reference_forward(model_bf16, inp, tgt)
    assert jnp.allclose(loss_bf16, ref_bf16, rtol=1e-2, atol=1e-5), (loss_bf16, ref_bf16)

    # Full-f32 path: exact check against the f32 reference.
    model_f32 = SimpleFeatureExtractor(
        in_channels=C, hidden_channels=8, layer_weights=[0.6, 0.4], key=k_w,
        compute_dtype=jnp.float32)
    loss_f32 = jax.block_until_ready(model_f32.forward(inp, tgt))
    ref_f32 = reference_forward(model_f32, inp, tgt)
    assert jnp.allclose(loss_f32, ref_f32, rtol=1e-5, atol=1e-6), (loss_f32, ref_f32)

    print("KERNEL_OK")
</pallas_src>

<mosaic_0001>
module attributes {stable_mosaic.version = 11 : i64} {
  func.func @_fused_perceptual_loss_kernel(%arg0: i32, %arg1: i32, %arg2: i32, %arg3: memref<8x4xbf16, #tpu.memory_space<vmem>>, %arg4: memref<8x8xbf16, #tpu.memory_space<vmem>>, %arg5: memref<1x4x256xbf16, #tpu.memory_space<vmem>>, %arg6: memref<1x4x256xbf16, #tpu.memory_space<vmem>>, %arg7: memref<1x1x2x256xf32, #tpu.memory_space<vmem>>) attributes {dimension_semantics = [#tpu.dimension_semantics<parallel>, #tpu.dimension_semantics<parallel>, #tpu.dimension_semantics<arbitrary>], iteration_bounds = array<i64: 2, 1, 1>, scalar_prefetch = 0 : i64, scratch_operands = 0 : i64, tpu.core_type = #tpu.core_type<tc>, window_params = [{pipeline_mode = #tpu.pipeline_mode<synchronous>, transform_indices = @transform_0, window_bounds = array<i64: 8, 4>}, {pipeline_mode = #tpu.pipeline_mode<synchronous>, transform_indices = @transform_1, window_bounds = array<i64: 8, 8>}, {transform_indices = @transform_2, window_bounds = array<i64: 1, 4, 256>}, {transform_indices = @transform_3, window_bounds = array<i64: 1, 4, 256>}, {transform_indices = @transform_4, window_bounds = array<i64: 1, 1, 2, 256>}]} {
    %c0_i32 = arith.constant 0 : i32
    %0 = arith.cmpi eq, %arg2, %c0_i32 : i32
    %1 = arith.extui %0 : i1 to i32
    %c0_i32_0 = arith.constant 0 : i32
    %2 = arith.cmpi ne, %1, %c0_i32_0 : i32
    scf.if %2 {
      %cst_30 = arith.constant 0.000000e+00 : f32
      %37 = vector.broadcast %cst_30 : f32 to vector<1x1x2x256xf32>
      %c0_31 = arith.constant 0 : index
      %c0_32 = arith.constant 0 : index
      %c0_33 = arith.constant 0 : index
      %c0_34 = arith.constant 0 : index
      %38 = vector.load %arg7[%c0_31, %c0_32, %c0_33, %c0_34] : memref<1x1x2x256xf32, #tpu.memory_space<vmem>>, vector<1x1x2x256xf32>
      tpu.vector_store %arg7[%c0_31, %c0_32, %c0_33, %c0_34], %37 {strides = array<i32>} : memref<1x1x2x256xf32, #tpu.memory_space<vmem>>, vector<1x1x2x256xf32>,
    } else {
    }
    %c0 = arith.constant 0 : index
    %c0_1 = arith.constant 0 : index
    %3 = vector.load %arg3[%c0, %c0_1] : memref<8x4xbf16, #tpu.memory_space<vmem>>, vector<8x4xbf16>
    %c0_2 = arith.constant 0 : index
    %c0_3 = arith.constant 0 : index
    %4 = vector.load %arg4[%c0_2, %c0_3] : memref<8x8xbf16, #tpu.memory_space<vmem>>, vector<8x8xbf16>
    %c0_4 = arith.constant 0 : index
    %c0_5 = arith.constant 0 : index
    %c0_6 = arith.constant 0 : index
    %5 = vector.load %arg5[%c0_4, %c0_5, %c0_6] : memref<1x4x256xbf16, #tpu.memory_space<vmem>>, vector<1x4x256xbf16>
    %6 = vector.shape_cast %5 : vector<1x4x256xbf16> to vector<4x256xbf16>
    %c0_7 = arith.constant 0 : index
    %c0_8 = arith.constant 0 : index
    %c0_9 = arith.constant 0 : index
    %7 = vector.load %arg6[%c0_7, %c0_8, %c0_9] : memref<1x4x256xbf16, #tpu.memory_space<vmem>>, vector<1x4x256xbf16>
    %8 = vector.shape_cast %7 : vector<1x4x256xbf16> to vector<4x256xbf16>
    %9 = tpu.concatenate %6, %8 in 1 : vector<4x256xbf16>, vector<4x256xbf16> -> vector<4x512xbf16>
    %cst = arith.constant dense<0.000000e+00> : vector<8x512xf32>
    %10 = tpu.matmul %3, %9, %cst {dimension_numbers = #tpu.dot_dimension_numbers<[1], [0], [0], [1], [0, 0, 1, 1], [], []>} : vector<8x4xbf16>, vector<4x512xbf16>, vector<8x512xf32> -> vector<8x512xf32>
    %cst_10 = arith.constant 0.000000e+00 : f32
    %11 = vector.broadcast %cst_10 : f32 to vector<8x512xf32>
    %12 = arith.maximumf %10, %11 : vector<8x512xf32>
    %13 = arith.truncf %12 : vector<8x512xf32> to vector<8x512xbf16>
    %cst_11 = arith.constant dense<0.000000e+00> : vector<8x512xf32>
    %14 = tpu.matmul %4, %13, %cst_11 {dimension_numbers = #tpu.dot_dimension_numbers<[1], [0], [0], [1], [0, 0, 1, 1], [], []>} : vector<8x8xbf16>, vector<8x512xbf16>, vector<8x512xf32> -> vector<8x512xf32>
    %cst_12 = arith.constant 0.000000e+00 : f32
    %15 = vector.broadcast %cst_12 : f32 to vector<8x512xf32>
    %16 = arith.maximumf %14, %15 : vector<8x512xf32>
    %17 = vector.extract_strided_slice %12 {offsets = [0, 0], sizes = [8, 256], strides = [1, 1]} : vector<8x512xf32> to vector<8x256xf32>
    %18 = vector.extract_strided_slice %12 {offsets = [0, 256], sizes = [8, 256], strides = [1, 1]} : vector<8x512xf32> to vector<8x256xf32>
    %19 = arith.subf %17, %18 : vector<8x256xf32>
    %20 = vector.extract_strided_slice %16 {offsets = [0, 0], sizes = [8, 256], strides = [1, 1]} : vector<8x512xf32> to vector<8x256xf32>
    %21 = vector.extract_strided_slice %16 {offsets = [0, 256], sizes = [8, 256], strides = [1, 1]} : vector<8x512xf32> to vector<8x256xf32>
    %22 = arith.subf %20, %21 : vector<8x256xf32>
    %c0_13 = arith.constant 0 : index
    %c0_14 = arith.constant 0 : index
    %c0_15 = arith.constant 0 : index
    %c0_16 = arith.constant 0 : index
    %23 = vector.load %arg7[%c0_13, %c0_14, %c0_15, %c0_16] : memref<1x1x2x256xf32, #tpu.memory_space<vmem>>, vector<1x1x1x256xf32>
    %24 = arith.mulf %19, %19 : vector<8x256xf32>
    %cst_17 = arith.constant dense<0.000000e+00> : vector<256xf32>
    %25 = vector.multi_reduction <add>, %24, %cst_17 [0] : vector<8x256xf32> to vector<256xf32>
    %26 = vector.shape_cast %25 : vector<256xf32> to vector<1x256xf32>
    %27 = vector.shape_cast %26 : vector<1x256xf32> to vector<1x1x1x256xf32>
    %28 = arith.addf %23, %27 : vector<1x1x1x256xf32>
    %c0_18 = arith.constant 0 : index
    %c0_19 = arith.constant 0 : index
    %c0_20 = arith.constant 0 : index
    %c0_21 = arith.constant 0 : index
    %29 = vector.load %arg7[%c0_18, %c0_19, %c0_20, %c0_21] : memref<1x1x2x256xf32, #tpu.memory_space<vmem>>, vector<1x1x1x256xf32>
    tpu.vector_store %arg7[%c0_18, %c0_19, %c0_20, %c0_21], %28 {strides = array<i32>} : memref<1x1x2x256xf32, #tpu.memory_space<vmem>>, vector<1x1x1x256xf32>,
    %c0_22 = arith.constant 0 : index
    %c0_23 = arith.constant 0 : index
    %c1 = arith.constant 1 : index
    %c0_24 = arith.constant 0 : index
    %30 = vector.load %arg7[%c0_22, %c0_23, %c1, %c0_24] : memref<1x1x2x256xf32, #tpu.memory_space<vmem>>, vector<1x1x1x256xf32>
    %31 = arith.mulf %22, %22 : vector<8x256xf32>
    %cst_25 = arith.constant dense<0.000000e+00> : vector<256xf32>
    %32 = vector.multi_reduction <add>, %31, %cst_25 [0] : vector<8x256xf32> to vector<256xf32>
    %33 = vector.shape_cast %32 : vector<256xf32> to vector<1x256xf32>
    %34 = vector.shape_cast %33 : vector<1x256xf32> to vector<1x1x1x256xf32>
    %35 = arith.addf %30, %34 : vector<1x1x1x256xf32>
    %c0_26 = arith.constant 0 : index
    %c0_27 = arith.constant 0 : index
    %c1_28 = arith.constant 1 : index
    %c0_29 = arith.constant 0 : index
    %36 = vector.load %arg7[%c0_26, %c0_27, %c1_28, %c0_29] : memref<1x1x2x256xf32, #tpu.memory_space<vmem>>, vector<1x1x1x256xf32>
    tpu.vector_store %arg7[%c0_26, %c0_27, %c1_28, %c0_29], %35 {strides = array<i32>} : memref<1x1x2x256xf32, #tpu.memory_space<vmem>>, vector<1x1x1x256xf32>,
    return
  }
  func.func @transform_0(%arg0: i32, %arg1: i32, %arg2: i32) -> (i32, i32) {
    %c0_i32 = arith.constant 0 : i32
    %c0_i32_0 = arith.constant 0 : i32
    %c0_i32_1 = arith.constant 0 : i32
    return %c0_i32, %c0_i32_0 : i32, i32
  }
  func.func @transform_1(%arg0: i32, %arg1: i32, %arg2: i32) -> (i32, i32) {
    %c0_i32 = arith.constant 0 : i32
    %c0_i32_0 = arith.constant 0 : i32
    %c0_i32_1 = arith.constant 0 : i32
    return %c0_i32, %c0_i32_0 : i32, i32
  }
  func.func @transform_2(%arg0: i32, %arg1: i32, %arg2: i32) -> (i32, i32, i32) {
    %c1_i32 = arith.constant 1 : i32
    %0 = arith.muli %arg1, %c1_i32 : i32
    %1 = arith.addi %0, %arg2 : i32
    %c0_i32 = arith.constant 0 : i32
    %c0_i32_0 = arith.constant 0 : i32
    return %arg0, %c0_i32, %1 : i32, i32, i32
  }
  func.func @transform_3(%arg0: i32, %arg1: i32, %arg2: i32) -> (i32, i32, i32) {
    %c1_i32 = arith.constant 1 : i32
    %0 = arith.muli %arg1, %c1_i32 : i32
    %1 = arith.addi %0, %arg2 : i32
    %c0_i32 = arith.constant 0 : i32
    %c0_i32_0 = arith.constant 0 : i32
    return %arg0, %c0_i32, %1 : i32, i32, i32
  }
  func.func @transform_4(%arg0: i32, %arg1: i32, %arg2: i32) -> (i32, i32, i32, i32) {
    %c0_i32 = arith.constant 0 : i32
    %c0_i32_0 = arith.constant 0 : i32
    %c0_i32_1 = arith.constant 0 : i32
    return %arg0, %arg1, %c0_i32, %c0_i32_0 : i32, i32, i32, i32
  }
}

</mosaic_0001>

<bundles_post_ra>
// kernel: tpu_custom_call.1
= control target key start
LH: loop header
LB: loop body
LE: loop exit
PB: predicated region body
PF: predicated region fallthrough
CT: control target
= control target key end

     0   :  { %9 = vsyncpa [#allocation3], 0  ;;  %s1127_s0 = inlined_call_operand.vmem [shape: bf16[8,4], index: 0, kind: input, shape index: {}]   ;;  %s1128_s1 = inlined_call_operand.hbm [shape: bf16[8,8], index: 1, kind: input, shape index: {}]   ;;  %s1129_s2 = inlined_call_operand.hbm [shape: bf16[2,4,256], index: 2, kind: input, shape index: {}]   ;;  %s1130_s3 = inlined_call_operand.vmem [shape: bf16[2,4,256], index: 3, kind: input, shape index: {}]   ;;  %s1131_s4 = inlined_call_operand.hbm [shape: f32[2,1,2,256], index: 4, kind: output, shape index: {}]  }
   0x1   :  { %10 = vsyncpa [#allocation6], 0 }
   0x2   :  { %12 = vsyncpa [#allocation6 + $0x1], 0 }
   0x3   :  { %13 = vsyncpa [#allocation4], 0 }
   0x4   :  { %15 = vsyncpa [#allocation4 + $0x1], 0  ;;  %s940_s15 = smov 0   ;;  %s942_s16 = smov 0  }
   0x5   :  { %s944_s17 = smov 0   ;;  %s946_s18 = smov 0  }
   0x6   :  { %s948_s19 = smov 0   ;;  %s950_s20 = smov 0  }
   0x7 LB: > { %s659_s21 = sadd.s32 4294967295, %s911_s20   ;;  %s660_s22 = sadd.s32 4294967294, %s911_s20   ;;  %s911_s20 = sphi %s950_s20, %s21_s20   ;;  %s907_s19 = sphi %s948_s19, %s1145_s19   ;;  %s903_s18 = sphi %s946_s18, %s1144_s18   ;;  %s899_s17 = sphi %s944_s17, %s1143_s17   ;;  %s895_s16 = sphi %s942_s16, %s1142_s16   ;;  %s891_s15 = sphi %s940_s15, %s1141_s15  }
   0x8   : > { %p106_p0 = scmp.ne.s32.totalorder %s895_s16, %s891_s15  ;;  %p974_p1 = scmp.eq.s32.totalorder %s659_s21, 0 }
   0x9   : > { %p978_p2 = scmp.eq.s32.totalorder %s659_s21, 1  ;;  %p168_p3 = scmp.eq.s32.totalorder %s660_s22, 1 }
   0xa   : > { %p984_p4 = por %p974_p1, %p106_p0  ;;  %p661_p5 = scmp.ge.s32.totalorder %s911_s20, 1 }
   0xb   : > { %p989_p6 = por %p168_p3, %p106_p0  ;;  %p175_p7 = scmp.lt.s32.totalorder %s911_s20, 3 }
   0xc   : > { %s190_s29 = sshll.u32 %s1128_s1, 4  ;;  %p663_p9 = scmp.ge.s32.totalorder %s911_s20, 2  ;;  %s191_s29 = int_to_ptr.hbm [resolvable:$true] %s190_s29 }
   0xd   : > { %p997_p8 = pnand %p661_p5, %p175_p7  ;;  %s913_s5 = smov [#allocation2]  }
   0xe   : > { %s192_s6 = sshll.u32 %s913_s5, 4  ;;  %s40_s7 = sadd.s32 1, %s907_s19  ;;  %s193_s6 = int_to_ptr.vmem [resolvable:$true] %s192_s6 }
   0xf   : > { %p699_p10 = pneg %p997_p8  ;;  %p42_p12 = scmp.ge.s32.totalorder %s40_s7, 2 }
  0x10   : > { %s93_s8 = sadd.s32 1, %s899_s17  ;;  %p100_p13 = scmp.ne.s32.totalorder %s899_s17, %s895_s16 }
  0x11   : > { %p700_p11 = pnand %p699_p10, %p974_p1  ;;  %p101_p0 = scmp.eq.s32.totalorder %s911_s20, 0 }
  0x12   : > { %s1147_s7 = smov (%p42_p12, %s40_s7), 0  ;;  %p1019_p5 = por %p978_p2, %p100_p13 }
  0x13   : > { %702 = dma.hbm_to_vmem [thread:$0]  (!%p700_p11), %s191_s29, 64, %s193_s6, [#allocation3]  }
  0x14   : > { %p1013_p3 = por %p101_p0, %p100_p13  ;;  %s88_s11 = ssub.s32 %s907_s19, %s1147_s7 }
  0x15   : > { %p712_p7 = scmp.lt.s32.totalorder %s911_s20, 2  ;;  %p91_p10 = scmp.eq.s32.totalorder %s88_s11, 0 }
  0x16   : > { %s203_s12 = sand.u32 1, %s899_s17   ;;  %s688_s21 = sshll.u32 %s907_s19, 2 }
  0x17   : > { %s664_s13 = sshll.u32 %s203_s12, 2  ;;  %s215_s28 = scalar_lea.hbm %s1129_s2, %s688_s21 }
  0x18   : > { %s1028_s14 = scalar_select %p91_p10, %s899_s17, %s93_s8  }
  0x19   : > { %s207_s29 = scalar_lea.vmem [#allocation5], %s664_s13  ;;  %s217_s24 = sshll.u32 %s215_s28, 4  ;;  %s218_s24 = int_to_ptr.hbm [resolvable:$true] %s217_s24 }
  0x1a   : > { %s219_s5 = sshll.u32 %s207_s29, 4  ;;  %p704_p2 = pnand %p712_p7, %p1013_p3  ;;  %s220_s5 = int_to_ptr.vmem [resolvable:$true] %s219_s5 }
  0x1b   : > { %s204_s6 = scalar_lea.sflag [#allocation6], %s203_s12  ;;  %243 = sbr.rel (%p997_p8) target bundleno = 356 (0x164), region = 36 }
  0x1c   : > { %706 = dma.hbm_to_vmem [thread:$0]  (!%p704_p2), %s218_s24, 64, %s220_s5, %s204_s6  }
  0x20   : > { %878 = dma.done.wait (%p974_p1), [#allocation3], 64  }
  0x21   : > { %880 = vsyncadd (%p974_p1), [#allocation3], 4294967232  ;;  %s1043_s8 = sand.u32 1, %s895_s16  }
  0x22   : > { %s669_s9 = sshll.u32 %s1043_s8, 2  ;;  %s251_s11 = scalar_lea.sflag [#allocation6], %s1043_s8 }
  0x23   : > { %s254_s12 = scalar_lea.vmem [#allocation5], %s669_s9 }
  0x24   : > { %882 = dma.done.wait (%p984_p4), %s251_s11, 64  }
  0x25   : > { %884 = vsyncadd (%p984_p4), %s251_s11, 4294967232  ;;  %p294_p8 = scmp.lt.s32.totalorder %s903_s18, 1  ;;  %v312_v0 = vld [vmem:[%s254_s12] sm:$0xf]  ;;  %vm326_vm0 = vcmask 1041408   ;;  %vm322_vm1 = vcmask 31744   ;;  %v494_v48 = vlaneseq }
  0x26   : > { %315 = vst [vmem:[#allocation1] ss:$4 sm:$0xff] %v312_v0  ;;  %v310_v6 = vld [vmem:[%s1127_s0] sm:$0xf]  ;;  %s1063_s28 = scalar_lea.vmem [#allocation7], %s669_s9  ;;  %v914_v11 = vmov 0.0  }
  0x27   : > { %s295_s23 = scalar_select %p294_p8, %s903_s18, 1  ;;  %309 = vst [vmem:[%s1063_s28] sm:$0xf] %v914_v11  ;;  %vm399_vm2 = vcmask 1043456   ;;  %v311_v20 = vld [vmem:[#allocation2] sm:$0xf]  ;;  %vm395_vm3 = vcmask 64512  }
  0x28   : > { %vm490_vm4 = vcmask 1040384   ;;  %vm1076_vm5 = vcmp.lt.s32.totalorder %v494_v48, 256  ;;  %s690_s29 = sshll.u32 %s903_s18, 2  ;;  %s538_s9 = sshll.u32 %s1063_s28, 4  ;;  %s539_s9 = int_to_ptr.vmem [resolvable:$true] %s538_s9 }
  0x29   : > { %s689_s30 = sshll.u32 %s295_s23, 2  ;;  %s536_s6 = scalar_lea.hbm %s1131_s4, %s690_s29 }
  0x2a   : > { %s301_s22 = scalar_lea.vmem %s1130_s3, %s689_s30  ;;  %s540_s11 = sshll.u32 %s536_s6, 4  ;;  %s541_s11 = int_to_ptr.hbm [resolvable:$true] %s540_s11 }
  0x2b   : > { %v313_v1 = vld [vmem:[%s301_s22] sm:$0xf]  ;;  %s523_s18 = scalar_lea.sflag [#allocation4], %s1043_s8  ;;  %s839_s12 = sshra.s32 %s541_s11, 4  ;;  %s840_s12 = int_to_ptr.hbm [resolvable:$true] %s839_s12 }
  0x2c   : > { %s841_s23 = scalar_lea.hbm %s840_s12, 4  ;;  %s845_s21 = scalar_lea.hbm %s1131_s4, 8 }
  0x2d   : > { %v316_v2 = vld.sshfl [vmem:[#allocation1] sm:$0xff pattern:$0x73625140]  ;;  %v317_v3 = vld.sshfl [vmem:[#allocation1 + $0x8] sm:$0xff pattern:$0x73625140]  ;;  %p842_p1 = scmp.ne.s32.totalorder %s840_s12, %s841_s23  ;;  %p846_p12 = scmp.lt.s32.totalorder %s840_s12, %s1131_s4 }
  0x2e   : > { %319 = vst [vmem:[#allocation1] ss:$4 sm:$0xff] %v313_v1  ;;  %v329_v4 = vsel %vm326_vm0, %v317_v3, 0  ;;  %v327_v5 = vsel %vm326_vm0, %v316_v2, 0  ;;  %p847_p13 = scmp.lt.s32.totalorder %s845_s21, %s841_s23 }
  0x2f   : > { %355 = vmatpush.bf16.msra.mxu1 %v329_v4  ;;  %342 = vmatpush.bf16.msra.mxu0 %v327_v5  ;;  %v472_v50 = vld [vmem:[%s1063_s28] ss:$2 sm:$0x3]  ;;  %p843_p4 = pnand %p842_p1, %p1019_p5 }
  0x30   : > { %p848_p0 = por %p847_p13, %p846_p12 }
  0x31   : > { %p844_p11 = pneg %p843_p4 }
  0x32   : > { %674 = vmatmul.msk.bf16.vlgmr.msra.gmra.mxu1 %vm322_vm1, %v310_v6  ;;  %673 = vmatmul.msk.bf16.vlgmr.msra.gmra.mxu0 %vm322_vm1, %v310_v6 }
  0x33   : > { %p849_p3 = pnand %p848_p0, %p844_p11 }
  0x35   : > { %v320_v7 = vld.sshfl [vmem:[#allocation1] sm:$0xff pattern:$0x73625140]  ;;  %v321_v8 = vld.sshfl [vmem:[#allocation1 + $0x8] sm:$0xff pattern:$0x73625140] }
  0x36   : > { %v331_v9 = vsel %vm326_vm0, %v320_v7, 0  ;;  %v333_v10 = vsel %vm326_vm0, %v321_v8, 0 }
  0x37   : > { %368 = vmatpush.bf16.msra.mxu2 %v331_v9  ;;  %381 = vmatpush.bf16.msra.mxu3 %v333_v10 }
  0x3a   : > { %675 = vmatmul.msk.bf16.vlgmr.msra.gmra.mxu2 %vm322_vm1, %v310_v6  ;;  %676 = vmatmul.msk.bf16.vlgmr.msra.gmra.mxu3 %vm322_vm1, %v310_v6 }
  0xaf   : > { %v357_v12 = vpop.f32.mrf.mxu1  ;;  %v344_v13 = vpop.f32.mrf.mxu0 }
  0xb0   : > { %v388_v14 = vmax.f32 %v357_v12, 0.0  ;;  %v387_v15 = vmax.f32 %v344_v13, 0.0 }
  0xb2   : > { %v392_v16 = vpack.c.bf16 %v388_v14, %v388_v14  ;;  %v391_v17 = vpack.c.bf16 %v387_v15, %v387_v15 }
  0xb4   : > { %v404_v18 = vsel %vm399_vm2, %v392_v16, 0  ;;  %v401_v19 = vsel %vm399_vm2, %v391_v17, 0 }
  0xb5   : > { %432 = vmatpush.bf16.msrb.mxu1 %v404_v18  ;;  %419 = vmatpush.bf16.msrb.mxu0 %v401_v19  ;;  %v681_v19 = vld [vmem:[%s1063_s28 + $0x1] ss:$2 sm:$0x3] }
  0xb7   : > { %v359_v21 = vpop.f32.mrf.mxu1  ;;  %v346_v22 = vpop.f32.mrf.mxu0 }
  0xb8   : > { %678 = vmatmul.msk.bf16.vlgmr.msrb.gmra.mxu1 %vm395_vm3, %v311_v20  ;;  %677 = vmatmul.msk.bf16.vlgmr.msrb.gmra.mxu0 %vm395_vm3, %v311_v20 }
  0xbd   : > { %v370_v23 = vpop.f32.mrf.mxu2  ;;  %v383_v24 = vpop.f32.mrf.mxu3 }
  0xbe   : > { %v389_v25 = vmax.f32 %v370_v23, 0.0  ;;  %v390_v26 = vmax.f32 %v383_v24, 0.0 }
  0xc0   : > { %v468_v27 = vsub.f32 %v387_v15, %v389_v25  ;;  %v469_v28 = vsub.f32 %v388_v14, %v390_v26  ;;  %v394_v29 = vpack.c.bf16 %v390_v26, %v390_v26  ;;  %v393_v30 = vpack.c.bf16 %v389_v25, %v389_v25 }
  0xc2   : > { %v473_v31 = vmul.f32 %v468_v27, %v468_v27  ;;  %v474_v32 = vmul.f32 %v469_v28, %v469_v28  ;;  %v410_v33 = vsel %vm399_vm2, %v394_v29, 0  ;;  %v407_v34 = vsel %vm399_vm2, %v393_v30, 0 }
  0xc3   : > { %458 = vmatpush.bf16.msrb.mxu3 %v410_v33  ;;  %445 = vmatpush.bf16.msrb.mxu2 %v407_v34 }
  0xc4   : > { %v475_v35 = vrot.slane %v473_v31, 4  ;;  %v481_v36 = vrot.slane %v474_v32, 4 }
  0xc5   : > { %v372_v37 = vpop.f32.mrf.mxu2  ;;  %v385_v38 = vpop.f32.mrf.mxu3 }
  0xc6   : > { %v476_v39 = vadd.f32 %v475_v35, %v473_v31  ;;  %v482_v40 = vadd.f32 %v481_v36, %v474_v32  ;;  %680 = vmatmul.msk.bf16.vlgmr.msrb.gmra.mxu3 %vm395_vm3, %v311_v20  ;;  %679 = vmatmul.msk.bf16.vlgmr.msrb.gmra.mxu2 %vm395_vm3, %v311_v20 }
  0xc8   : > { %v477_v41 = vrot.slane %v476_v39, 2  ;;  %v483_v42 = vrot.slane %v482_v40, 2 }
  0xca   : > { %v478_v43 = vadd.f32 %v477_v41, %v476_v39  ;;  %v484_v44 = vadd.f32 %v483_v42, %v482_v40 }
  0xcc   : > { %v479_v45 = vrot.slane %v478_v43, 1  ;;  %v485_v46 = vrot.slane %v484_v44, 1 }
  0xce   : > { %v486_v47 = vadd.f32 %v485_v46, %v484_v44  ;;  %v480_v49 = vadd.f32 %v479_v45, %v478_v43 }
  0xd0   : > { %v489_v51 = vrot.slane %v486_v47, 7 }
  0xd2   : > { %v491_v52 = vsel %vm490_vm4, %v480_v49, %v489_v51 }
  0xd3   : > { %v493_v54 = vadd.f32 %v491_v52, %v472_v50 }
  0xd5   : > { %498 = vst.msk [vmem:[%s1063_s28] ss:$2 sm:$0x3] %vm1076_vm5, %v493_v54 }
 0x135   : > { %v434_v55 = vpop.f32.mrf.mxu1  ;;  %v421_v56 = vpop.f32.mrf.mxu0 }
 0x136   : > { %v465_v59 = vmax.f32 %v434_v55, 0.0  ;;  %v464_v60 = vmax.f32 %v421_v56, 0.0 }
 0x13d   : > { %v436_v57 = vpop.f32.mrf.mxu1  ;;  %v423_v58 = vpop.f32.mrf.mxu0 }
 0x149   : > { %v460_v61 = vpop.f32.mrf.mxu3  ;;  %v447_v62 = vpop.f32.mrf.mxu2 }
 0x14a   : > { %v467_v63 = vmax.f32 %v460_v61, 0.0  ;;  %v466_v0 = vmax.f32 %v447_v62, 0.0 }
 0x14c   : > { %v471_v1 = vsub.f32 %v465_v59, %v467_v63  ;;  %v470_v2 = vsub.f32 %v464_v60, %v466_v0 }
 0x14e   : > { %v502_v3 = vmul.f32 %v471_v1, %v471_v1  ;;  %v501_v4 = vmul.f32 %v470_v2, %v470_v2 }
 0x150   : > { %v509_v5 = vrot.slane %v502_v3, 4  ;;  %v503_v6 = vrot.slane %v501_v4, 4 }
 0x151   : > { %v462_v7 = vpop.f32.mrf.mxu3  ;;  %v449_v8 = vpop.f32.mrf.mxu2 }
 0x152   : > { %v510_v9 = vadd.f32 %v509_v5, %v502_v3  ;;  %v504_v10 = vadd.f32 %v503_v6, %v501_v4 }
 0x154   : > { %v511_v11 = vrot.slane %v510_v9, 2  ;;  %v505_v12 = vrot.slane %v504_v10, 2 }
 0x156   : > { %v512_v13 = vadd.f32 %v511_v11, %v510_v9  ;;  %v506_v14 = vadd.f32 %v505_v12, %v504_v10 }
 0x158   : > { %v513_v15 = vrot.slane %v512_v13, 1  ;;  %v507_v16 = vrot.slane %v506_v14, 1 }
 0x15a   : > { %v514_v17 = vadd.f32 %v513_v15, %v512_v13  ;;  %v508_v20 = vadd.f32 %v507_v16, %v506_v14 }
 0x15c   : > { %v517_v18 = vrot.slane %v514_v17, 7 }
 0x15e   : > { %v518_v21 = vsel %vm490_vm4, %v508_v20, %v517_v18 }
 0x15f   : > { %v520_v22 = vadd.f32 %v681_v19, %v518_v21 }
 0x161   : > { %682 = vst.msk [vmem:[%s1063_s28 + $0x1] ss:$2 sm:$0x3] %vm1076_vm5, %v520_v22 }
 0x162   : > { %852 = shalt.err (!%p849_p3)
}
 0x163   : > { %697 = dma.vmem_to_hbm [thread:$0]  (%p1019_p5), %s539_s9, 64, %s541_s11, %s523_s18  }
 0x164 PF: > { %s552_s8 = sand.u32 1, %s891_s15   ;;  %p708_p7 = pnand %p663_p9, %p989_p6 }
 0x165   : > { %s553_s27 = scalar_lea.sflag [#allocation4], %s552_s8 }
 0x166   : > { %p709_p10 = pneg %p708_p7 }
 0x168   : > { %886 = dma.done.wait (%p709_p10), %s553_s27, 64  }
 0x169   : > { %888 = vsyncadd (%p709_p10), %s553_s27, 4294967232  ;;  %s21_s20 = sadd.s32 1, %s911_s20   ;;  %s1141_s15 = smov %s895_s16 }
 0x16a   : > { %p18_p2 = scmp.ge.s32.totalorder %s21_s20, 4   ;;  %s1142_s16 = smov %s899_s17 }
 0x16b   : > { %s1143_s17 = smov %s1028_s14  ;;  %s1144_s18 = smov %s907_s19 }
 0x16c   : > { %s1145_s19 = smov %s1147_s7  ;;  %20 = sbr.rel (!%p18_p2) target bundleno = 7 (0x7), region = 94 }
 0x171   :  { %559 = vsyncpa [#allocation3], 1 }
 0x172   :  { %561 = vsyncpa [#allocation3 + $0x1], 1 }
 0x173   :  { %562 = vsyncpa [#allocation6], 1 }
 0x174   :  { %564 = vsyncpa [#allocation6 + $0x1], 1 }
 0x175   :  { %565 = vsyncpa [#allocation4], 1 }
 0x176   :  { %567 = vsyncpa [#allocation4 + $0x1], 1 }

</bundles_post_ra>
